<compile_context>
chip_gen: v5e
topology: v5e:2x2
jax: 0.10.0
libtpu: 0.0.40
codegen_flags: <defaults>
</compile_context>

<pallas_src>
import jax
import jax.numpy as jnp
from jax import lax
from jax.experimental import pallas as pl
from jax.experimental.pallas import tpu as pltpu

# ---- small config (consistent with the module's forward) -------------------
B = 2            # batch
T = 8            # seq len (num_tokens)
D = 32           # emb_dim
H = 4            # n_heads
HD = D // H      # head_dim
HID = 64         # hidden_dim of the FFN
CTX = 16         # context_length (>= T)
EPS = 1e-5

MXU_DTYPE = jnp.bfloat16   # MXU operand dtype (accumulation stays f32)
NEG_INF = -1e30            # finite mask value (NaN-safe vs. -inf)


# ---------------------------------------------------------------------------
# RoPE table precompute (plain JAX glue, identical to precompute_rope_params)
# ---------------------------------------------------------------------------
def precompute_rope_params(head_dim, theta_base=10000.0, context_length=4096):
    inv_freq = 1.0 / theta_base ** (
        jnp.arange(0, head_dim, 2)[: head_dim // 2].astype(jnp.float32) / head_dim
    )
    positions = jnp.arange(context_length).astype(jnp.float32)
    angles = positions[:, None] * inv_freq[None, :]
    angles = jnp.concatenate([angles, angles], axis=1)
    return jnp.cos(angles), jnp.sin(angles)


# ---------------------------------------------------------------------------
# One-time parameter prep: weight fusion + constant folding (load-time cost)
# ---------------------------------------------------------------------------
def _rotate_half_cols(w):
    """Apply per-head rotate_half (with sign) to the OUTPUT columns of w.

    Valid because rotate_half is a signed permutation of the output columns of
    a linear map:  rotate_half(x @ w) == x @ rotate_half_cols(w).
    """
    w3 = w.reshape(w.shape[0], H, HD)
    w3r = jnp.concatenate([-w3[..., HD // 2:], w3[..., : HD // 2]], axis=-1)
    return w3r.reshape(w.shape)


def fuse_params(params, mxu_dtype=MXU_DTYPE):
    """Fold RMSNorm gains + softmax scale into the weights, pre-build the
    rotated Q/K weight columns, and cast all MXU weights to bf16 once."""
    # NOTE: folding 1/sqrt(HD) into wq *before* RoPE is valid because RoPE is
    # linear in q (scaling commutes with the rotation).
    scale = 1.0 / jnp.sqrt(jnp.float32(HD))
    g1 = params["g1"][:, None]
    g2 = params["g2"][:, None]
    wq = g1 * params["wq"] * scale
    wk = g1 * params["wk"]
    wv = g1 * params["wv"]
    # (5, D, D) stack: [q, rot(q), k, rot(k), v] -> leading-dim indexed in-kernel
    w5 = jnp.stack([wq, _rotate_half_cols(wq), wk, _rotate_half_cols(wk), wv],
                   axis=0)
    w12 = g2 * jnp.concatenate([params["w1"], params["w2"]], axis=1)  # (D, 2*HID)
    return {"w5": w5.astype(mxu_dtype),
            "wo": params["wo"].astype(mxu_dtype),
            "w12": w12.astype(mxu_dtype),
            "w3": params["w3"].astype(mxu_dtype)}


def build_tables(cos, sin):
    """Precompute all attention constants (one aux slab + one bias)."""
    # cos/sin tiled over batch rows and head columns -> flat (B*T, D) tables
    cos2d = jnp.tile(cos, (B, H)).astype(jnp.float32)                  # (B*T, D)
    sin2d = jnp.tile(sin, (B, H)).astype(jnp.float32)
    # per-head column masks (H, B*T, D): 1.0 on head h's columns, else 0.0
    col_head = jnp.arange(D) // HD
    hmask = (col_head[None, :] == jnp.arange(H)[:, None]).astype(jnp.float32)
    hmask = jnp.broadcast_to(hmask[:, None, :], (H, B * T, D))
    aux = jnp.concatenate([cos2d[None], sin2d[None], hmask], axis=0)   # (2+H, B*T, D)
    # combined causal + same-batch additive bias over the flat token axis
    idx = jnp.arange(B * T)
    same_batch = (idx[:, None] // T) == (idx[None, :] // T)
    causal = idx[None, :] <= idx[:, None]
    bias = jnp.where(same_batch & causal, 0.0, NEG_INF).astype(jnp.float32)
    return aux, bias


# ---------------------------------------------------------------------------
# Pallas kernel: whole batch in one grid step, zero in-kernel relayouts
# ---------------------------------------------------------------------------
def transformer_block_kernel(x_ref, w5_ref, wo_ref, w12_ref, w3_ref,
                             aux_ref, bias_ref, o_ref):
    x = x_ref[...]                                               # (B*T, D) f32

    # ---- RMSNorm #1 (gain folded into w5) ----------------------------------
    xn = x * lax.rsqrt(jnp.mean(x * x, axis=-1, keepdims=True) + EPS)
    xn = xn.astype(MXU_DTYPE)                                    # bf16 MXU operand

    # ---- fused Q / rot(Q) / K / rot(K) / V projections ----------------------
    # (5, D, D) weight stack; leading-dim ref indexing is free (no lane slices)
    def proj(i):
        return jnp.dot(xn, w5_ref[i], preferred_element_type=jnp.float32)
    q = proj(0)
    q_rot = proj(1)
    k = proj(2)
    k_rot = proj(3)
    v = proj(4)                                                  # (B*T, D) f32

    # ---- RoPE in the flat (B*T, D) layout: 2 FMAs, no slices / rolls --------
    aux = aux_ref[...]                                           # (2+H, B*T, D)
    cos2d = aux[0]
    sin2d = aux[1]
    hmask = aux[2:2 + H]                                         # (H, B*T, D)
    q = q * cos2d + q_rot * sin2d                                # scale already in wq
    k = k * cos2d + k_rot * sin2d

    # ---- attention, batched over heads via column masks ---------------------
    # Masking Q (and V) to head-h columns makes the full-D contraction equal
    # the per-head HD contraction; no (B,H,T,HD) transpose / stack is needed.
    qm = (q[None] * hmask).astype(MXU_DTYPE)                     # (H, B*T, D)
    km = jnp.concatenate([k.astype(MXU_DTYPE)[None]] * H, axis=0)
    vm = (v[None] * hmask).astype(MXU_DTYPE)

    s = jnp.einsum("hqd,hkd->hqk", qm, km,
                   preferred_element_type=jnp.float32)           # (H, B*T, B*T)
    s = s + bias_ref[...][None]                                  # causal + same-batch
    s = s - jnp.max(s, axis=-1, keepdims=True)                   # f32 softmax stats
    e = jnp.exp(s)
    p = e * pl.reciprocal(jnp.sum(e, axis=-1, keepdims=True), approx=True)
    ctx = jnp.einsum("hqk,hkd->hqd", p.astype(MXU_DTYPE), vm,
                     preferred_element_type=jnp.float32)         # (H, B*T, D)

    # ---- head merge: each h only populates its own columns -> just add ------
    ctx2d = ctx[0]
    for h in range(1, H):
        ctx2d = ctx2d + ctx[h]                                   # (B*T, D)

    attn = jnp.dot(ctx2d.astype(MXU_DTYPE), wo_ref[...],
                   preferred_element_type=jnp.float32)
    x2 = attn + x

    # ---- RMSNorm #2 (gain folded into w12) + fused SwiGLU FFN ---------------
    x2n = x2 * lax.rsqrt(jnp.mean(x2 * x2, axis=-1, keepdims=True) + EPS)
    f12 = jnp.dot(x2n.astype(MXU_DTYPE), w12_ref[...],
                  preferred_element_type=jnp.float32)            # (B*T, 2*HID)
    f1 = f12[:, :HID]
    f2 = f12[:, HID:]
    gate = (f1 * jax.nn.sigmoid(f1)) * f2                        # SiLU(f1) * f2
    ff = jnp.dot(gate.astype(MXU_DTYPE), w3_ref[...],
                 preferred_element_type=jnp.float32)

    o_ref[...] = (ff + x2).astype(o_ref.dtype)


def transformer_block(x, fused, aux, bias):
    """x: (B, T, D) float32. fused: dict from fuse_params()."""
    b, t, d = x.shape
    x2d = x.reshape(b * t, d)                     # free layout plumbing

    full = lambda shape: pl.BlockSpec(shape, lambda i: (0,) * len(shape))

    out2d = pl.pallas_call(
        transformer_block_kernel,
        out_shape=jax.ShapeDtypeStruct((b * t, d), x.dtype),
        grid_spec=pltpu.PrefetchScalarGridSpec(
            num_scalar_prefetch=0,
            grid=(1,),                             # single step: whole slab
            in_specs=[
                full((b * t, d)),                  # x
                full(fused["w5"].shape),           # (5, D, D)  bf16
                full(fused["wo"].shape),           # (D, D)     bf16
                full(fused["w12"].shape),          # (D, 2*HID) bf16
                full(fused["w3"].shape),           # (HID, D)   bf16
                full(aux.shape),                   # (2+H, B*T, D) f32
                full(bias.shape),                  # (B*T, B*T)    f32
            ],
            out_specs=full((b * t, d)),
        ),
        compiler_params=pltpu.CompilerParams(
            dimension_semantics=("arbitrary",),
        ),
    )(x2d, fused["w5"], fused["wo"], fused["w12"], fused["w3"], aux, bias)
    return out2d.reshape(b, t, d)


# ---------------------------------------------------------------------------
# Pure-JAX reference (mirrors the PyTorch forward exactly, unfused weights)
# ---------------------------------------------------------------------------
def reference_block(x, params, cos, sin):
    def rmsnorm(t, g):
        means = jnp.mean(t * t, axis=-1, keepdims=True)
        return t * lax.rsqrt(means + EPS) * g

    def rope4(t):  # t: (B, H, T, HD)
        t1 = t[..., : HD // 2]
        t2 = t[..., HD // 2:]
        rotated = jnp.concatenate([-t2, t1], axis=-1)
        return t * cos[None, None] + rotated * sin[None, None]

    h1 = rmsnorm(x, params["g1"])
    q = h1 @ params["wq"]
    k = h1 @ params["wk"]
    v = h1 @ params["wv"]
    q = q.reshape(B, T, H, HD).transpose(0, 2, 1, 3)
    k = k.reshape(B, T, H, HD).transpose(0, 2, 1, 3)
    v = v.reshape(B, T, H, HD).transpose(0, 2, 1, 3)
    q = rope4(q)
    k = rope4(k)
    scores = jnp.einsum("bhqd,bhkd->bhqk", q, k)
    mask = jnp.triu(jnp.ones((T, T), dtype=bool), k=1)
    scores = jnp.where(mask[None, None], -jnp.inf, scores)
    w = jax.nn.softmax(scores / jnp.sqrt(jnp.float32(HD)), axis=-1)
    ctx = jnp.einsum("bhqk,bhkd->bhqd", w, v).transpose(0, 2, 1, 3).reshape(B, T, D)
    attn_out = ctx @ params["wo"]
    x2 = attn_out + x

    h2 = rmsnorm(x2, params["g2"])
    f1 = h2 @ params["w1"]
    f2 = h2 @ params["w2"]
    ff = ((f1 * jax.nn.sigmoid(f1)) * f2) @ params["w3"]
    return ff + x2


# ---------------------------------------------------------------------------
if __name__ == "__main__":
    key = jax.random.PRNGKey(0)
    keys = jax.random.split(key, 10)

    def init(k, shape):
        return (0.02 * jax.random.normal(k, shape)).astype(jnp.float32)

    # linear weights stored as (in_features, out_features) — pre-transposed
    params = {
        "wq": init(keys[0], (D, D)),
        "wk": init(keys[1], (D, D)),
        "wv": init(keys[2], (D, D)),
        "wo": init(keys[3], (D, D)),
        "w1": init(keys[4], (D, HID)),
        "w2": init(keys[5], (D, HID)),
        "w3": init(keys[6], (HID, D)),
        # non-trivial RMSNorm gains to exercise the gain-folding path
        "g1": (1.0 + 0.1 * jax.random.normal(keys[8], (D,))).astype(jnp.float32),
        "g2": (1.0 + 0.1 * jax.random.normal(keys[9], (D,))).astype(jnp.float32),
    }

    cos_full, sin_full = precompute_rope_params(HD, context_length=CTX)
    cos = cos_full[:T, :]
    sin = sin_full[:T, :]

    x = jax.random.normal(keys[7], (B, T, D), dtype=jnp.float32)

    fused = fuse_params(params)          # one-time (load-time) weight prep
    aux, bias = build_tables(cos, sin)   # one-time constant tables

    out = transformer_block(x, fused, aux, bias)
    out = jax.block_until_ready(out)

    ref = reference_block(x, params, cos, sin)
    assert out.shape == (B, T, D) and out.dtype == jnp.float32
    # error budget vs. the f32 reference: bf16 MXU operands (~5e-4 abs at these
    # magnitudes) + EUP approx reciprocal in the softmax (~1e-3 relative on the
    # small attention term) -> comfortably inside 5e-3.
    assert jnp.allclose(out, ref, atol=5e-3, rtol=5e-3), "mismatch vs reference"

    print("KERNEL_OK")
</pallas_src>

<mosaic_0001>
module attributes {stable_mosaic.version = 11 : i64} {
  func.func @transformer_block_kernel(%arg0: i32, %arg1: memref<16x32xf32, #tpu.memory_space<vmem>>, %arg2: memref<5x32x32xbf16, #tpu.memory_space<vmem>>, %arg3: memref<32x32xbf16, #tpu.memory_space<vmem>>, %arg4: memref<32x128xbf16, #tpu.memory_space<vmem>>, %arg5: memref<64x32xbf16, #tpu.memory_space<vmem>>, %arg6: memref<6x16x32xf32, #tpu.memory_space<vmem>>, %arg7: memref<16x16xf32, #tpu.memory_space<vmem>>, %arg8: memref<16x32xf32, #tpu.memory_space<vmem>>) attributes {dimension_semantics = [#tpu.dimension_semantics<arbitrary>], iteration_bounds = array<i64: 1>, scalar_prefetch = 0 : i64, scratch_operands = 0 : i64, tpu.core_type = #tpu.core_type<tc>, window_params = [{pipeline_mode = #tpu.pipeline_mode<synchronous>, transform_indices = @transform_0, window_bounds = array<i64: 16, 32>}, {pipeline_mode = #tpu.pipeline_mode<synchronous>, transform_indices = @transform_1, window_bounds = array<i64: 5, 32, 32>}, {pipeline_mode = #tpu.pipeline_mode<synchronous>, transform_indices = @transform_2, window_bounds = array<i64: 32, 32>}, {pipeline_mode = #tpu.pipeline_mode<synchronous>, transform_indices = @transform_3, window_bounds = array<i64: 32, 128>}, {pipeline_mode = #tpu.pipeline_mode<synchronous>, transform_indices = @transform_4, window_bounds = array<i64: 64, 32>}, {pipeline_mode = #tpu.pipeline_mode<synchronous>, transform_indices = @transform_5, window_bounds = array<i64: 6, 16, 32>}, {pipeline_mode = #tpu.pipeline_mode<synchronous>, transform_indices = @transform_6, window_bounds = array<i64: 16, 16>}, {pipeline_mode = #tpu.pipeline_mode<synchronous>, transform_indices = @transform_7, window_bounds = array<i64: 16, 32>}]} {
    %c0 = arith.constant 0 : index
    %c0_0 = arith.constant 0 : index
    %0 = vector.load %arg1[%c0, %c0_0] : memref<16x32xf32, #tpu.memory_space<vmem>>, vector<16x32xf32>
    %1 = arith.mulf %0, %0 : vector<16x32xf32>
    %cst = arith.constant dense<0.000000e+00> : vector<16xf32>
    %2 = vector.multi_reduction <add>, %1, %cst [1] : vector<16x32xf32> to vector<16xf32>
    %3 = vector.shape_cast %2 : vector<16xf32> to vector<16x1xf32>
    %cst_1 = arith.constant 3.200000e+01 : f32
    %4 = vector.broadcast %cst_1 : f32 to vector<16x1xf32>
    %5 = arith.divf %3, %4 : vector<16x1xf32>
    %cst_2 = arith.constant 9.99999974E-6 : f32
    %6 = vector.broadcast %cst_2 : f32 to vector<16x1xf32>
    %7 = arith.addf %5, %6 : vector<16x1xf32>
    %8 = math.rsqrt %7 : vector<16x1xf32>
    %9 = vector.broadcast %8 : vector<16x1xf32> to vector<16x32xf32>
    %10 = arith.mulf %0, %9 : vector<16x32xf32>
    %11 = arith.truncf %10 : vector<16x32xf32> to vector<16x32xbf16>
    %c0_3 = arith.constant 0 : index
    %c0_4 = arith.constant 0 : index
    %c0_5 = arith.constant 0 : index
    %12 = vector.load %arg2[%c0_3, %c0_4, %c0_5] : memref<5x32x32xbf16, #tpu.memory_space<vmem>>, vector<1x32x32xbf16>
    %13 = vector.shape_cast %12 : vector<1x32x32xbf16> to vector<32x32xbf16>
    %cst_6 = arith.constant dense<0.000000e+00> : vector<16x32xf32>
    %14 = tpu.matmul %11, %13, %cst_6 {dimension_numbers = #tpu.dot_dimension_numbers<[1], [0], [0], [1], [0, 0, 1, 1], [], []>} : vector<16x32xbf16>, vector<32x32xbf16>, vector<16x32xf32> -> vector<16x32xf32>
    %c1 = arith.constant 1 : index
    %c0_7 = arith.constant 0 : index
    %c0_8 = arith.constant 0 : index
    %15 = vector.load %arg2[%c1, %c0_7, %c0_8] : memref<5x32x32xbf16, #tpu.memory_space<vmem>>, vector<1x32x32xbf16>
    %16 = vector.shape_cast %15 : vector<1x32x32xbf16> to vector<32x32xbf16>
    %cst_9 = arith.constant dense<0.000000e+00> : vector<16x32xf32>
    %17 = tpu.matmul %11, %16, %cst_9 {dimension_numbers = #tpu.dot_dimension_numbers<[1], [0], [0], [1], [0, 0, 1, 1], [], []>} : vector<16x32xbf16>, vector<32x32xbf16>, vector<16x32xf32> -> vector<16x32xf32>
    %c2 = arith.constant 2 : index
    %c0_10 = arith.constant 0 : index
    %c0_11 = arith.constant 0 : index
    %18 = vector.load %arg2[%c2, %c0_10, %c0_11] : memref<5x32x32xbf16, #tpu.memory_space<vmem>>, vector<1x32x32xbf16>
    %19 = vector.shape_cast %18 : vector<1x32x32xbf16> to vector<32x32xbf16>
    %cst_12 = arith.constant dense<0.000000e+00> : vector<16x32xf32>
    %20 = tpu.matmul %11, %19, %cst_12 {dimension_numbers = #tpu.dot_dimension_numbers<[1], [0], [0], [1], [0, 0, 1, 1], [], []>} : vector<16x32xbf16>, vector<32x32xbf16>, vector<16x32xf32> -> vector<16x32xf32>
    %c3 = arith.constant 3 : index
    %c0_13 = arith.constant 0 : index
    %c0_14 = arith.constant 0 : index
    %21 = vector.load %arg2[%c3, %c0_13, %c0_14] : memref<5x32x32xbf16, #tpu.memory_space<vmem>>, vector<1x32x32xbf16>
    %22 = vector.shape_cast %21 : vector<1x32x32xbf16> to vector<32x32xbf16>
    %cst_15 = arith.constant dense<0.000000e+00> : vector<16x32xf32>
    %23 = tpu.matmul %11, %22, %cst_15 {dimension_numbers = #tpu.dot_dimension_numbers<[1], [0], [0], [1], [0, 0, 1, 1], [], []>} : vector<16x32xbf16>, vector<32x32xbf16>, vector<16x32xf32> -> vector<16x32xf32>
    %c4 = arith.constant 4 : index
    %c0_16 = arith.constant 0 : index
    %c0_17 = arith.constant 0 : index
    %24 = vector.load %arg2[%c4, %c0_16, %c0_17] : memref<5x32x32xbf16, #tpu.memory_space<vmem>>, vector<1x32x32xbf16>
    %25 = vector.shape_cast %24 : vector<1x32x32xbf16> to vector<32x32xbf16>
    %cst_18 = arith.constant dense<0.000000e+00> : vector<16x32xf32>
    %26 = tpu.matmul %11, %25, %cst_18 {dimension_numbers = #tpu.dot_dimension_numbers<[1], [0], [0], [1], [0, 0, 1, 1], [], []>} : vector<16x32xbf16>, vector<32x32xbf16>, vector<16x32xf32> -> vector<16x32xf32>
    %c0_19 = arith.constant 0 : index
    %c0_20 = arith.constant 0 : index
    %c0_21 = arith.constant 0 : index
    %27 = vector.load %arg6[%c0_19, %c0_20, %c0_21] : memref<6x16x32xf32, #tpu.memory_space<vmem>>, vector<6x16x32xf32>
    %28 = vector.extract_strided_slice %27 {offsets = [0, 0, 0], sizes = [1, 16, 32], strides = [1, 1, 1]} : vector<6x16x32xf32> to vector<1x16x32xf32>
    %29 = vector.shape_cast %28 : vector<1x16x32xf32> to vector<16x32xf32>
    %30 = vector.extract_strided_slice %27 {offsets = [1, 0, 0], sizes = [1, 16, 32], strides = [1, 1, 1]} : vector<6x16x32xf32> to vector<1x16x32xf32>
    %31 = vector.shape_cast %30 : vector<1x16x32xf32> to vector<16x32xf32>
    %32 = vector.extract_strided_slice %27 {offsets = [2, 0, 0], sizes = [4, 16, 32], strides = [1, 1, 1]} : vector<6x16x32xf32> to vector<4x16x32xf32>
    %33 = arith.mulf %14, %29 : vector<16x32xf32>
    %34 = arith.mulf %17, %31 : vector<16x32xf32>
    %35 = arith.addf %33, %34 : vector<16x32xf32>
    %36 = arith.mulf %20, %29 : vector<16x32xf32>
    %37 = arith.mulf %23, %31 : vector<16x32xf32>
    %38 = arith.addf %36, %37 : vector<16x32xf32>
    %39 = vector.shape_cast %35 : vector<16x32xf32> to vector<1x16x32xf32>
    %40 = vector.broadcast %39 : vector<1x16x32xf32> to vector<4x16x32xf32>
    %41 = arith.mulf %40, %32 : vector<4x16x32xf32>
    %42 = arith.truncf %41 : vector<4x16x32xf32> to vector<4x16x32xbf16>
    %43 = arith.truncf %38 : vector<16x32xf32> to vector<16x32xbf16>
    %44 = vector.shape_cast %43 : vector<16x32xbf16> to vector<1x16x32xbf16>
    %45 = tpu.concatenate %44, %44, %44, %44 in 0 : vector<1x16x32xbf16>, vector<1x16x32xbf16>, vector<1x16x32xbf16>, vector<1x16x32xbf16> -> vector<4x16x32xbf16>
    %46 = vector.shape_cast %26 : vector<16x32xf32> to vector<1x16x32xf32>
    %47 = vector.broadcast %46 : vector<1x16x32xf32> to vector<4x16x32xf32>
    %48 = arith.mulf %47, %32 : vector<4x16x32xf32>
    %49 = arith.truncf %48 : vector<4x16x32xf32> to vector<4x16x32xbf16>
    "tpu.trace_start"() <{level = 10 : i32, message = "hqd,hkd->hqk"}> : () -> ()
    %cst_22 = arith.constant dense<0.000000e+00> : vector<4x16x16xf32>
    %50 = tpu.matmul %42, %45, %cst_22 {dimension_numbers = #tpu.dot_dimension_numbers<[2], [2], [1], [1], [0, 0, 0, 1, 1, 1], [0], [0]>} : vector<4x16x32xbf16>, vector<4x16x32xbf16>, vector<4x16x16xf32> -> vector<4x16x16xf32>
    "tpu.trace_stop"() : () -> ()
    %c0_23 = arith.constant 0 : index
    %c0_24 = arith.constant 0 : index
    %51 = vector.load %arg7[%c0_23, %c0_24] : memref<16x16xf32, #tpu.memory_space<vmem>>, vector<16x16xf32>
    %52 = vector.shape_cast %51 : vector<16x16xf32> to vector<1x16x16xf32>
    %53 = vector.broadcast %52 : vector<1x16x16xf32> to vector<4x16x16xf32>
    %54 = arith.addf %50, %53 : vector<4x16x16xf32>
    %cst_25 = arith.constant dense<0xFF800000> : vector<4x16xf32>
    %55 = vector.multi_reduction <maximumf>, %54, %cst_25 [2] : vector<4x16x16xf32> to vector<4x16xf32>
    %56 = vector.shape_cast %55 : vector<4x16xf32> to vector<4x16x1xf32>
    %57 = vector.broadcast %56 : vector<4x16x1xf32> to vector<4x16x16xf32>
    %58 = arith.subf %54, %57 : vector<4x16x16xf32>
    %59 = math.exp %58 : vector<4x16x16xf32>
    %cst_26 = arith.constant dense<0.000000e+00> : vector<4x16xf32>
    %60 = vector.multi_reduction <add>, %59, %cst_26 [2] : vector<4x16x16xf32> to vector<4x16xf32>
    %61 = vector.shape_cast %60 : vector<4x16xf32> to vector<4x16x1xf32>
    %62 = tpu.reciprocal %61 {approx = true} : vector<4x16x1xf32> -> vector<4x16x1xf32>
    %63 = vector.broadcast %62 : vector<4x16x1xf32> to vector<4x16x16xf32>
    %64 = arith.mulf %59, %63 : vector<4x16x16xf32>
    %65 = arith.truncf %64 : vector<4x16x16xf32> to vector<4x16x16xbf16>
    "tpu.trace_start"() <{level = 10 : i32, message = "hqk,hkd->hqd"}> : () -> ()
    %cst_27 = arith.constant dense<0.000000e+00> : vector<4x16x32xf32>
    %66 = tpu.matmul %65, %49, %cst_27 {dimension_numbers = #tpu.dot_dimension_numbers<[2], [1], [1], [2], [0, 0, 0, 1, 1, 2], [0], [0]>} : vector<4x16x16xbf16>, vector<4x16x32xbf16>, vector<4x16x32xf32> -> vector<4x16x32xf32>
    "tpu.trace_stop"() : () -> ()
    %67 = vector.extract_strided_slice %66 {offsets = [0, 0, 0], sizes = [1, 16, 32], strides = [1, 1, 1]} : vector<4x16x32xf32> to vector<1x16x32xf32>
    %68 = vector.shape_cast %67 : vector<1x16x32xf32> to vector<16x32xf32>
    %69 = vector.extract_strided_slice %66 {offsets = [1, 0, 0], sizes = [1, 16, 32], strides = [1, 1, 1]} : vector<4x16x32xf32> to vector<1x16x32xf32>
    %70 = vector.shape_cast %69 : vector<1x16x32xf32> to vector<16x32xf32>
    %71 = arith.addf %68, %70 : vector<16x32xf32>
    %72 = vector.extract_strided_slice %66 {offsets = [2, 0, 0], sizes = [1, 16, 32], strides = [1, 1, 1]} : vector<4x16x32xf32> to vector<1x16x32xf32>
    %73 = vector.shape_cast %72 : vector<1x16x32xf32> to vector<16x32xf32>
    %74 = arith.addf %71, %73 : vector<16x32xf32>
    %75 = vector.extract_strided_slice %66 {offsets = [3, 0, 0], sizes = [1, 16, 32], strides = [1, 1, 1]} : vector<4x16x32xf32> to vector<1x16x32xf32>
    %76 = vector.shape_cast %75 : vector<1x16x32xf32> to vector<16x32xf32>
    %77 = arith.addf %74, %76 : vector<16x32xf32>
    %78 = arith.truncf %77 : vector<16x32xf32> to vector<16x32xbf16>
    %c0_28 = arith.constant 0 : index
    %c0_29 = arith.constant 0 : index
    %79 = vector.load %arg3[%c0_28, %c0_29] : memref<32x32xbf16, #tpu.memory_space<vmem>>, vector<32x32xbf16>
    %cst_30 = arith.constant dense<0.000000e+00> : vector<16x32xf32>
    %80 = tpu.matmul %78, %79, %cst_30 {dimension_numbers = #tpu.dot_dimension_numbers<[1], [0], [0], [1], [0, 0, 1, 1], [], []>} : vector<16x32xbf16>, vector<32x32xbf16>, vector<16x32xf32> -> vector<16x32xf32>
    %81 = arith.addf %80, %0 : vector<16x32xf32>
    %82 = arith.mulf %81, %81 : vector<16x32xf32>
    %cst_31 = arith.constant dense<0.000000e+00> : vector<16xf32>
    %83 = vector.multi_reduction <add>, %82, %cst_31 [1] : vector<16x32xf32> to vector<16xf32>
    %84 = vector.shape_cast %83 : vector<16xf32> to vector<16x1xf32>
    %cst_32 = arith.constant 3.200000e+01 : f32
    %85 = vector.broadcast %cst_32 : f32 to vector<16x1xf32>
    %86 = arith.divf %84, %85 : vector<16x1xf32>
    %cst_33 = arith.constant 9.99999974E-6 : f32
    %87 = vector.broadcast %cst_33 : f32 to vector<16x1xf32>
    %88 = arith.addf %86, %87 : vector<16x1xf32>
    %89 = math.rsqrt %88 : vector<16x1xf32>
    %90 = vector.broadcast %89 : vector<16x1xf32> to vector<16x32xf32>
    %91 = arith.mulf %81, %90 : vector<16x32xf32>
    %92 = arith.truncf %91 : vector<16x32xf32> to vector<16x32xbf16>
    %c0_34 = arith.constant 0 : index
    %c0_35 = arith.constant 0 : index
    %93 = vector.load %arg4[%c0_34, %c0_35] : memref<32x128xbf16, #tpu.memory_space<vmem>>, vector<32x128xbf16>
    %cst_36 = arith.constant dense<0.000000e+00> : vector<16x128xf32>
    %94 = tpu.matmul %92, %93, %cst_36 {dimension_numbers = #tpu.dot_dimension_numbers<[1], [0], [0], [1], [0, 0, 1, 1], [], []>} : vector<16x32xbf16>, vector<32x128xbf16>, vector<16x128xf32> -> vector<16x128xf32>
    %95 = vector.extract_strided_slice %94 {offsets = [0, 0], sizes = [16, 64], strides = [1, 1]} : vector<16x128xf32> to vector<16x64xf32>
    %96 = vector.extract_strided_slice %94 {offsets = [0, 64], sizes = [16, 64], strides = [1, 1]} : vector<16x128xf32> to vector<16x64xf32>
    %97 = arith.negf %95 : vector<16x64xf32>
    %98 = math.exp %97 : vector<16x64xf32>
    %cst_37 = arith.constant 1.000000e+00 : f32
    %99 = vector.broadcast %cst_37 : f32 to vector<16x64xf32>
    %100 = arith.addf %99, %98 : vector<16x64xf32>
    %101 = arith.divf %99, %100 : vector<16x64xf32>
    %102 = arith.mulf %95, %101 : vector<16x64xf32>
    %103 = arith.mulf %102, %96 : vector<16x64xf32>
    %104 = arith.truncf %103 : vector<16x64xf32> to vector<16x64xbf16>
    %c0_38 = arith.constant 0 : index
    %c0_39 = arith.constant 0 : index
    %105 = vector.load %arg5[%c0_38, %c0_39] : memref<64x32xbf16, #tpu.memory_space<vmem>>, vector<64x32xbf16>
    %cst_40 = arith.constant dense<0.000000e+00> : vector<16x32xf32>
    %106 = tpu.matmul %104, %105, %cst_40 {dimension_numbers = #tpu.dot_dimension_numbers<[1], [0], [0], [1], [0, 0, 1, 1], [], []>} : vector<16x64xbf16>, vector<64x32xbf16>, vector<16x32xf32> -> vector<16x32xf32>
    %107 = arith.addf %106, %81 : vector<16x32xf32>
    %c0_41 = arith.constant 0 : index
    %c0_42 = arith.constant 0 : index
    %108 = vector.load %arg8[%c0_41, %c0_42] : memref<16x32xf32, #tpu.memory_space<vmem>>, vector<16x32xf32>
    tpu.vector_store %arg8[%c0_41, %c0_42], %107 {strides = array<i32>} : memref<16x32xf32, #tpu.memory_space<vmem>>, vector<16x32xf32>,
    return
  }
  func.func @transform_0(%arg0: i32) -> (i32, i32) {
    %c0_i32 = arith.constant 0 : i32
    %c0_i32_0 = arith.constant 0 : i32
    %c0_i32_1 = arith.constant 0 : i32
    return %c0_i32, %c0_i32_0 : i32, i32
  }
  func.func @transform_1(%arg0: i32) -> (i32, i32, i32) {
    %c0_i32 = arith.constant 0 : i32
    %c0_i32_0 = arith.constant 0 : i32
    %c0_i32_1 = arith.constant 0 : i32
    %c0_i32_2 = arith.constant 0 : i32
    return %c0_i32, %c0_i32_0, %c0_i32_1 : i32, i32, i32
  }
  func.func @transform_2(%arg0: i32) -> (i32, i32) {
    %c0_i32 = arith.constant 0 : i32
    %c0_i32_0 = arith.constant 0 : i32
    %c0_i32_1 = arith.constant 0 : i32
    return %c0_i32, %c0_i32_0 : i32, i32
  }
  func.func @transform_3(%arg0: i32) -> (i32, i32) {
    %c0_i32 = arith.constant 0 : i32
    %c0_i32_0 = arith.constant 0 : i32
    %c0_i32_1 = arith.constant 0 : i32
    return %c0_i32, %c0_i32_0 : i32, i32
  }
  func.func @transform_4(%arg0: i32) -> (i32, i32) {
    %c0_i32 = arith.constant 0 : i32
    %c0_i32_0 = arith.constant 0 : i32
    %c0_i32_1 = arith.constant 0 : i32
    return %c0_i32, %c0_i32_0 : i32, i32
  }
  func.func @transform_5(%arg0: i32) -> (i32, i32, i32) {
    %c0_i32 = arith.constant 0 : i32
    %c0_i32_0 = arith.constant 0 : i32
    %c0_i32_1 = arith.constant 0 : i32
    %c0_i32_2 = arith.constant 0 : i32
    return %c0_i32, %c0_i32_0, %c0_i32_1 : i32, i32, i32
  }
  func.func @transform_6(%arg0: i32) -> (i32, i32) {
    %c0_i32 = arith.constant 0 : i32
    %c0_i32_0 = arith.constant 0 : i32
    %c0_i32_1 = arith.constant 0 : i32
    return %c0_i32, %c0_i32_0 : i32, i32
  }
  func.func @transform_7(%arg0: i32) -> (i32, i32) {
    %c0_i32 = arith.constant 0 : i32
    %c0_i32_0 = arith.constant 0 : i32
    %c0_i32_1 = arith.constant 0 : i32
    return %c0_i32, %c0_i32_0 : i32, i32
  }
}

</mosaic_0001>

<bundles_post_ra>
// kernel: tpu_custom_call.1
= control target key start
LH: loop header
LB: loop body
LE: loop exit
PB: predicated region body
PF: predicated region fallthrough
CT: control target
= control target key end

     0   :  { %12 = vsyncpa [#allocation3], 0  ;;  %s1314_s0 = inlined_call_operand.vmem [shape: f32[16,32], index: 0, kind: input, shape index: {}]   ;;  %s1315_s1 = inlined_call_operand.hbm [shape: bf16[5,32,32], index: 1, kind: input, shape index: {}]   ;;  %s1316_s2 = inlined_call_operand.vmem [shape: bf16[32,32], index: 2, kind: input, shape index: {}]   ;;  %s1317_s3 = inlined_call_operand.vmem [shape: bf16[32,128], index: 3, kind: input, shape index: {}]   ;;  %s1318_s4 = inlined_call_operand.vmem [shape: bf16[64,32], index: 4, kind: input, shape index: {}]   ;;  %s1319_s5 = inlined_call_operand.hbm [shape: f32[6,16,32], index: 5, kind: input, shape index: {}]   ;;  %s1320_s6 = inlined_call_operand.hbm [shape: f32[16,16], index: 6, kind: input, shape index: {}]   ;;  %s1321_s7 = inlined_call_operand.hbm [shape: f32[16,32], index: 7, kind: output, shape index: {}]  }
   0x1   :  { %13 = vsyncpa [#allocation6], 0  ;;  %s40_s26 = sshll.u32 %s1319_s5, 4  ;;  %s41_s26 = int_to_ptr.hbm [resolvable:$true] %s40_s26 }
   0x2   :  { %14 = vsyncpa [#allocation4], 0  ;;  %s1142_s27 = smov [#allocation5]   ;;  %s21_s8 = sshll.u32 %s1315_s1, 4  ;;  %s22_s8 = int_to_ptr.hbm [resolvable:$true] %s21_s8 }
   0x3   :  { %s42_s28 = sshll.u32 %s1142_s27, 4  ;;  %s1143_s9 = smov 128   ;;  %s43_s28 = int_to_ptr.vmem [resolvable:$true] %s42_s28 }
   0x4   :  { %s1144_s10 = smov 8   ;;  %s1145_s11 = smov [#allocation2]  }
   0x5   :  { %48 = dma.hbm_to_vmem [thread:$0]  %s41_s26, 1536, %s43_s28, [#allocation6], %s1143_s9, %s1143_s9, %s1144_s10  }
   0x6   :  { %s23_s12 = sshll.u32 %s1145_s11, 4  ;;  %s1146_s5 = smov 64   ;;  %s24_s12 = int_to_ptr.vmem [resolvable:$true] %s23_s12 }
   0x7   :  { %s1147_s13 = smov 4   ;;  %s53_s16 = sshll.u32 %s1320_s6, 4  ;;  %s54_s16 = int_to_ptr.hbm [resolvable:$true] %s53_s16 }
   0x8   :  { %29 = dma.hbm_to_vmem [thread:$0]  %s22_s8, 1280, %s24_s12, [#allocation3], %s1146_s5, %s1146_s5, %s1147_s13  }
   0x9   :  { %s1148_s1 = smov [#allocation7]  }
   0xa   :  { %s55_s17 = sshll.u32 %s1148_s1, 4  ;;  %s56_s17 = int_to_ptr.vmem [resolvable:$true] %s55_s17 }
   0xb   :  { %61 = dma.hbm_to_vmem [thread:$0]  %s54_s16, 256, %s56_s17, [#allocation6], %s1143_s9, %s1143_s9, %s1144_s10  }
   0xc   :  { %1136 = dma.done.wait [#allocation3], 1280  }
   0xd   :  { %1137 = vsyncadd [#allocation3], 4294966016 }
   0xe   :  { %1138 = dma.done.wait [#allocation6], 1792  }
   0xf   :  { %1139 = vsyncadd [#allocation6], 4294965504  ;;  %v1211_v0 = vld [vmem:[%s1314_s0] sm:$0xff]  ;;  %vm79_vm0 = vcmask 261120   ;;  %v1218_v2 = vld [vmem:[%s1314_s0 + $0x8] sm:$0xff]  ;;  %v1149_v6 = vmov 32.0  }
  0x10   :  { %v77_v1 = vmul.f32 %v1211_v0, %v1211_v0  ;;  %v78_v4 = vmul.f32 %v1218_v2, %v1218_v2  ;;  %990 = vrcp.f32 %v1149_v6  ;;  %v964_v12 = vld [vmem:[#allocation2 + $0x8] sm:$0xff]  ;;  %v966_v13 = vld [vmem:[#allocation2 + $0x18] sm:$0xff]  ;;  %v963_v17 = vld [vmem:[#allocation2] sm:$0xff]  ;;  %vm433_vm8 = vcmask 130048   ;;  %s859_s15 = sshll.u32 %s1321_s7, 4  ;;  %s860_s15 = int_to_ptr.hbm [resolvable:$true] %s859_s15 }
  0x11   :  { %v968_v14 = vld [vmem:[#allocation2 + $0x28] sm:$0xff]  ;;  %v970_v15 = vld [vmem:[#allocation2 + $0x38] sm:$0xff]  ;;  %145 = vmatpush.bf16.msra.mxu0 %v964_v12  ;;  %176 = vmatpush.bf16.msra.mxu1 %v966_v13  ;;  %v965_v18 = vld [vmem:[#allocation2 + $0x10] sm:$0xff] }
  0x12   :  { %v80_v3 = vsel %vm79_vm0, %v77_v1, 0.0  ;;  %v83_v5 = vsel %vm79_vm0, %v78_v4, 0.0  ;;  %207 = vmatpush.bf16.msra.mxu2 %v968_v14  ;;  %238 = vmatpush.bf16.msra.mxu3 %v970_v15  ;;  %v967_v19 = vld [vmem:[#allocation2 + $0x20] sm:$0xff]  ;;  %v969_v20 = vld [vmem:[#allocation2 + $0x30] sm:$0xff]  ;;  %v972_v24 = vld [vmem:[#allocation2 + $0x48] sm:$0xff] }
  0x13   :  { %81 = vadd.xlane.f32.xlu0 %v80_v3  ;;  %v971_v25 = vld [vmem:[#allocation2 + $0x40] sm:$0xff]  ;;  %v277_v48 = vld [vmem:[#allocation5] sm:$0xff]  ;;  %v278_v52 = vld [vmem:[#allocation5 + $0x8] sm:$0xff] }
  0x14   :  { %v279_v49 = vld [vmem:[#allocation5 + $0x10] sm:$0xff]  ;;  %v280_v53 = vld [vmem:[#allocation5 + $0x18] sm:$0xff]  ;;  %v281_v3 = vld [vmem:[#allocation5 + $0x20] sm:$0xff] }
  0x15   :  { %146 = vmatpush.bf16.msra.mxu0 %v963_v17  ;;  %177 = vmatpush.bf16.msra.mxu1 %v965_v18  ;;  %v283_v4 = vld [vmem:[#allocation5 + $0x30] sm:$0xff]  ;;  %v286_v14 = vld [vmem:[#allocation5 + $0x48] sm:$0xff]  ;;  %v288_v15 = vld [vmem:[#allocation5 + $0x58] sm:$0xff] }
  0x16   :  { %v991_v7 = vpop.eup %990  ;;  %208 = vmatpush.bf16.msra.mxu2 %v967_v19  ;;  %239 = vmatpush.bf16.msra.mxu3 %v969_v20  ;;  %v287_v13 = vld [vmem:[#allocation5 + $0x50] sm:$0xff] }
  0x17   :  { %v87_v8 = vmul.f32 32.0, %v991_v7  ;;  %vm91_vm1 = vweird.f32 %v991_v7 }
  0x19   :  { %v88_v9 = vsub.f32 1.0, %v87_v8  ;;  %269 = vmatpush.bf16.msrb.mxu0 %v972_v24  ;;  %v282_v8 = vld [vmem:[#allocation5 + $0x28] sm:$0xff] }
  0x1b   :  { %84 = vadd.xlane.f32.xlu0 %v83_v5  ;;  %v89_v10 = vmul.f32 %v991_v7, %v88_v9  ;;  %v284_v9 = vld [vmem:[#allocation5 + $0x38] sm:$0xff] }
  0x1d   :  { %v90_v11 = vadd.f32 %v991_v7, %v89_v10  ;;  %270 = vmatpush.bf16.msrb.mxu0 %v971_v25 }
  0x1f   :  { %v1224_v16 = vsel %vm91_vm1, %v991_v7, %v90_v11  ;;  %v285_v7 = vld [vmem:[#allocation5 + $0x40] sm:$0xff] }
  0x86   :  { %v82_v21 = vpop.xlane.xlu0 %81 }
  0x87   :  { %v93_v22 = vmul.f32 %v1224_v16, %v82_v21 }
  0x89   :  { %v95_v23 = vadd.f32 1e-05, %v93_v22 }
  0x8b   :  { %992 = vrsqrt.f32 %v95_v23  ;;  %vm103_vm3 = vweird.f32 %v95_v23 }
  0x8e   :  { %v85_v26 = vpop.xlane.xlu0 %84 }
  0x8f   :  { %v94_v27 = vmul.f32 %v1224_v16, %v85_v26 }
  0x91   :  { %v993_v28 = vpop.eup %992  ;;  %v96_v29 = vadd.f32 1e-05, %v94_v27 }
  0x92   :  { %v98_v30 = vmul.f32 %v993_v28, %v95_v23  ;;  %vm104_vm2 = vweird.f32 %v993_v28 }
  0x93   :  { %994 = vrsqrt.f32 %v96_v29  ;;  %vm105_vm5 = vmor %vm103_vm3, %vm104_vm2  ;;  %vm113_vm6 = vweird.f32 %v96_v29 }
  0x94   :  { %v99_v31 = vmul.f32 %v993_v28, %v98_v30 }
  0x96   :  { %v100_v32 = vmul.f32 0.5, %v99_v31 }
  0x98   :  { %v101_v34 = vsub.f32 1.5, %v100_v32 }
  0x99   :  { %v995_v33 = vpop.eup %994 }
  0x9a   :  { %v108_v35 = vmul.f32 %v995_v33, %v96_v29  ;;  %v102_v37 = vmul.f32 %v993_v28, %v101_v34  ;;  %vm114_vm4 = vweird.f32 %v995_v33 }
  0x9b   :  { %vm115_vm7 = vmor %vm113_vm6, %vm114_vm4 }
  0x9c   :  { %v109_v36 = vmul.f32 %v995_v33, %v108_v35  ;;  %v106_v40 = vsel %vm105_vm5, %v993_v28, %v102_v37 }
  0x9d   :  { %v117_v43 = vmul.f32 %v106_v40, %v1211_v0 }
  0x9e   :  { %v110_v38 = vmul.f32 0.5, %v109_v36 }
  0xa0   :  { %v111_v39 = vsub.f32 1.5, %v110_v38 }
  0xa2   :  { %v112_v41 = vmul.f32 %v995_v33, %v111_v39 }
  0xa4   :  { %v116_v42 = vsel %vm115_vm7, %v995_v33, %v112_v41 }
  0xa5   :  { %v118_v44 = vmul.f32 %v116_v42, %v1218_v2 }
  0xa7   :  { %v119_v45 = vpack.c.bf16 %v118_v44, %v117_v43 }
  0xa9   :  { %881 = vmatmul.msk.bf16.vlgmr.msra.gmra.mxu0 %vm79_vm0, %v119_v45  ;;  %890 = vmatmul.msk.bf16.vlgmr.msra.gmra.mxu1 %vm79_vm0, %v119_v45 }
  0xaa   :  { %899 = vmatmul.msk.bf16.vlgmr.msra.gmra.mxu2 %vm79_vm0, %v119_v45  ;;  %908 = vmatmul.msk.bf16.vlgmr.msra.gmra.mxu3 %vm79_vm0, %v119_v45 }
  0xb9   :  { %917 = vmatmul.msk.bf16.vlgmr.msrb.gmra.mxu0 %vm79_vm0, %v119_v45 }
 0x126   :  { %v148_v46 = vpop.f32.mrf.mxu0  ;;  %v179_v47 = vpop.f32.mrf.mxu1 }
 0x127   :  { %v289_v56 = vmul.f32 %v277_v48, %v148_v46  ;;  %v291_v57 = vmul.f32 %v279_v49, %v179_v47 }
 0x129   :  { %v293_v62 = vadd.f32 %v291_v57, %v289_v56 }
 0x12b   :  { %v301_v18 = vmul.f32 %v293_v62, %v281_v3  ;;  %v303_v19 = vmul.f32 %v293_v62, %v283_v4  ;;  %v305_v23 = vmul.f32 %v293_v62, %v285_v7  ;;  %v307_v24 = vmul.f32 %v293_v62, %v287_v13 }
 0x12d   :  { %v210_v50 = vpop.f32.mrf.mxu2  ;;  %v241_v51 = vpop.f32.mrf.mxu3  ;;  %v309_v32 = vpack.c.bf16 %v301_v18, %v301_v18  ;;  %v311_v33 = vpack.c.bf16 %v303_v19, %v303_v19  ;;  %v313_v38 = vpack.c.bf16 %v305_v23, %v305_v23  ;;  %v315_v39 = vpack.c.bf16 %v307_v24, %v307_v24 }
 0x12e   :  { %v150_v54 = vpop.f32.mrf.mxu0  ;;  %v181_v55 = vpop.f32.mrf.mxu1  ;;  %v295_v58 = vmul.f32 %v277_v48, %v210_v50  ;;  %v297_v59 = vmul.f32 %v279_v49, %v241_v51 }
 0x12f   :  { %v290_v60 = vmul.f32 %v278_v52, %v150_v54  ;;  %v292_v61 = vmul.f32 %v280_v53, %v181_v55 }
 0x130   :  { %v299_v63 = vadd.f32 %v297_v59, %v295_v58 }
 0x131   :  { %v294_v1 = vadd.f32 %v292_v61, %v290_v60 }
 0x132   :  { %v317_v17 = vpack.c.bf16 %v299_v63, %v299_v63 }
 0x133   :  { %v302_v21 = vmul.f32 %v294_v1, %v282_v8  ;;  %v304_v22 = vmul.f32 %v294_v1, %v284_v9  ;;  %v306_v25 = vmul.f32 %v294_v1, %v286_v14  ;;  %v308_v26 = vmul.f32 %v294_v1, %v288_v15 }
 0x134   :  { %v344_v31 = vunpack.c.l.b16 %v317_v17 }
 0x135   :  { %v212_v5 = vpop.f32.mrf.mxu2  ;;  %v243_v6 = vpop.f32.mrf.mxu3  ;;  %v310_v36 = vpack.c.bf16 %v302_v21, %v302_v21  ;;  %v312_v37 = vpack.c.bf16 %v304_v22, %v304_v22  ;;  %v314_v40 = vpack.c.bf16 %v306_v25, %v306_v25  ;;  %v316_v41 = vpack.c.bf16 %v308_v26, %v308_v26 }
 0x136   :  { %v296_v10 = vmul.f32 %v278_v52, %v212_v5  ;;  %v298_v11 = vmul.f32 %v280_v53, %v243_v6  ;;  %v272_v12 = vpop.f32.mrf.mxu0  ;;  %v339_v5 = vunpack.c.l.b16 %v309_v32  ;;  %v369_v6 = vunpack.c.l.b16 %v311_v33 }
 0x137   :  { %v319_v28 = vmul.f32 %v281_v3, %v272_v12  ;;  %v321_v29 = vmul.f32 %v283_v4, %v272_v12  ;;  %v323_v30 = vmul.f32 %v285_v7, %v272_v12  ;;  %v325_v35 = vmul.f32 %v287_v13, %v272_v12 }
 0x138   :  { %v300_v20 = vadd.f32 %v298_v11, %v296_v10  ;;  %v340_v52 = vunpack.c.l.b16 %v310_v36  ;;  %v370_v53 = vunpack.c.l.b16 %v312_v37  ;;  %v392_v62 = vunpack.c.l.b16 %v314_v40 }
 0x139   :  { %v327_v42 = vpack.c.bf16 %v319_v28, %v319_v28  ;;  %v329_v43 = vpack.c.bf16 %v321_v29, %v321_v29  ;;  %v331_v44 = vpack.c.bf16 %v323_v30, %v323_v30  ;;  %v333_v51 = vpack.c.bf16 %v325_v35, %v325_v35  ;;  %v336_v29 = vld [vmem:[#allocation7 + $0x8] sm:$0xff] }
 0x13a   :  { %v318_v27 = vpack.c.bf16 %v300_v20, %v300_v20  ;;  %v391_v7 = vunpack.c.l.b16 %v313_v38  ;;  %v413_v13 = vunpack.c.l.b16 %v315_v39  ;;  %v335_v20 = vld [vmem:[#allocation7] sm:$0xff] }
 0x13b   :  { %v537_v59 = vunpack.c.l.b16 %v327_v42  ;;  %v565_v60 = vunpack.c.l.b16 %v329_v43  ;;  %v593_v61 = vunpack.c.l.b16 %v331_v44 }
 0x13c   :  { %v345_v34 = vunpack.c.l.b16 %v318_v27  ;;  %v393_v17 = vpack.c.b16 %v392_v62, %v391_v7 }
 0x13e   :  { %v274_v45 = vpop.f32.mrf.mxu0  ;;  %v346_v46 = vpack.c.b16 %v345_v34, %v344_v31 }
 0x13f   :  { %v320_v47 = vmul.f32 %v282_v8, %v274_v45  ;;  %v322_v48 = vmul.f32 %v284_v9, %v274_v45  ;;  %v324_v49 = vmul.f32 %v286_v14, %v274_v45  ;;  %v326_v50 = vmul.f32 %v288_v15, %v274_v45 }
 0x140   :  { %v351_v54 = vsel %vm79_vm0, %v346_v46, 0  ;;  %v414_v8 = vunpack.c.l.b16 %v316_v41  ;;  %v621_v9 = vunpack.c.l.b16 %v333_v51  ;;  %v341_v14 = vpack.c.b16 %v340_v52, %v339_v5 }
 0x141   :  { %v328_v55 = vpack.c.bf16 %v320_v47, %v320_v47  ;;  %v330_v56 = vpack.c.bf16 %v322_v48, %v322_v48  ;;  %v332_v57 = vpack.c.bf16 %v324_v49, %v324_v49  ;;  %v334_v58 = vpack.c.bf16 %v326_v50, %v326_v50  ;;  %360 = vmatpush.bf16.xpose.msrb.mxu1 %v351_v54 }
 0x142   :  { %382 = vmatpush.bf16.xpose.msrb.mxu2 %v351_v54  ;;  %404 = vmatpush.bf16.xpose.msrb.mxu3 %v351_v54  ;;  %v371_v15 = vpack.c.b16 %v370_v53, %v369_v6  ;;  %v415_v19 = vpack.c.b16 %v414_v8, %v413_v13 }
 0x143   :  { %v538_v63 = vunpack.c.l.b16 %v328_v55  ;;  %v566_v1 = vunpack.c.l.b16 %v330_v56  ;;  %v594_v3 = vunpack.c.l.b16 %v332_v57  ;;  %v622_v4 = vunpack.c.l.b16 %v334_v58  ;;  %426 = vmatpush.bf16.xpose.msra.mxu0 %v351_v54 }
 0x145   :  { %v539_v10 = vpack.c.b16 %v538_v63, %v537_v59  ;;  %v567_v11 = vpack.c.b16 %v566_v1, %v565_v60  ;;  %v595_v12 = vpack.c.b16 %v594_v3, %v593_v61  ;;  %v623_v18 = vpack.c.b16 %v622_v4, %v621_v9 }
 0x148   :  { %918 = vmatmul.msk.bf16.vlgmr.msrb.gmra.mxu1 %vm79_vm0, %v341_v14 }
 0x149   :  { %551 = vmatpush.bf16.msra.mxu1 %v539_v10  ;;  %919 = vmatmul.msk.bf16.vlgmr.msrb.gmra.mxu2 %vm79_vm0, %v371_v15 }
 0x14a   :  { %579 = vmatpush.bf16.msra.mxu2 %v567_v11  ;;  %607 = vmatpush.bf16.msra.mxu3 %v595_v12 }
 0x14b   :  { %920 = vmatmul.msk.bf16.vlgmr.msrb.gmra.mxu3 %vm79_vm0, %v393_v17  ;;  %921 = vmatmul.msk.bf16.vlgmr.msra.gmra.mxu0 %vm79_vm0, %v415_v19 }
 0x14c   :  { %635 = vmatpush.bf16.msrb.mxu0 %v623_v18 }
 0x1c5   :  { %v362_v21 = vpop.f32.mrf.mxu1 }
 0x1c6   :  { %v363_v22 = vadd.f32 %v362_v21, %v335_v20 }
 0x1c8   :  { %v428_v23 = vpop.f32.mrf.mxu0  ;;  %v434_v24 = vsel %vm433_vm8, %v363_v22, -inf }
 0x1c9   :  { %435 = vmax.xlane.f32.xlu0 %v434_v24  ;;  %v429_v42 = vadd.f32 %v428_v23, %v335_v20 }
 0x1cb   :  { %v452_v45 = vsel %vm433_vm8, %v429_v42, -inf }
 0x1cc   :  { %v384_v25 = vpop.f32.mrf.mxu2 }
 0x1cd   :  { %v385_v27 = vadd.f32 %v384_v25, %v335_v20  ;;  %v364_v41 = vpop.f32.mrf.mxu1 }
 0x1ce   :  { %v406_v26 = vpop.f32.mrf.mxu3  ;;  %v365_v43 = vadd.f32 %v364_v41, %v336_v29 }
 0x1cf   :  { %v407_v28 = vadd.f32 %v406_v26, %v335_v20  ;;  %v440_v32 = vsel %vm433_vm8, %v385_v27, -inf }
 0x1d0   :  { %v430_v30 = vpop.f32.mrf.mxu0  ;;  %441 = vmax.xlane.f32.xlu1 %v440_v32  ;;  %v437_v44 = vsel %vm433_vm8, %v365_v43, -inf }
 0x1d1   :  { %v446_v31 = vsel %vm433_vm8, %v407_v28, -inf  ;;  %v431_v33 = vadd.f32 %v430_v30, %v336_v29 }
 0x1d2   :  { %447 = vmax.xlane.f32.xlu2 %v446_v31 }
 0x1d3   :  { %v455_v34 = vsel %vm433_vm8, %v431_v33, -inf }
 0x1d4   :  { %456 = vmax.xlane.f32.xlu0 %v455_v34  ;;  %v386_v35 = vpop.f32.mrf.mxu2 }
 0x1d5   :  { %v387_v37 = vadd.f32 %v386_v35, %v336_v29 }
 0x1d6   :  { %v408_v36 = vpop.f32.mrf.mxu3 }
 0x1d7   :  { %v409_v38 = vadd.f32 %v408_v36, %v336_v29  ;;  %v443_v40 = vsel %vm433_vm8, %v387_v37, -inf }
 0x1d8   :  { %444 = vmax.xlane.f32.xlu1 %v443_v40 }
 0x1d9   :  { %v449_v39 = vsel %vm433_vm8, %v409_v38, -inf }
 0x1da   :  { %450 = vmax.xlane.f32.xlu2 %v449_v39 }
 0x1e0   :  { %438 = vmax.xlane.f32.xlu1 %v437_v44 }
 0x1e2   :  { %453 = vmax.xlane.f32.xlu2 %v452_v45 }
 0x23c   :  { %v436_v52 = vpop.xlane.xlu0 %435 }
 0x23d   :  { %v458_v61 = vsub.f32 %v363_v22, %v436_v52 }
 0x23f   :  { %v466_v1 = vmul.f32 1.442695, %v458_v61 }
 0x243   :  { %v442_v47 = vpop.xlane.xlu1 %441 }
 0x244   :  { %v460_v49 = vsub.f32 %v385_v27, %v442_v47 }
 0x245   :  { %v448_v46 = vpop.xlane.xlu2 %447 }
 0x246   :  { %v462_v48 = vsub.f32 %v407_v28, %v448_v46  ;;  %v470_v51 = vmul.f32 1.442695, %v460_v49 }
 0x247   :  { %v457_v5 = vpop.xlane.xlu0 %456 }
 0x248   :  { %v474_v50 = vmul.f32 1.442695, %v462_v48  ;;  %v465_v12 = vsub.f32 %v431_v33, %v457_v5 }
 0x24a   :  { %996 = vpow2.f32 %v474_v50  ;;  %v480_v15 = vmul.f32 1.442695, %v465_v12 }
 0x24b   :  { %998 = vpow2.f32 %v470_v51  ;;  %v445_v54 = vpop.xlane.xlu1 %444 }
 0x24c   :  { %v461_v56 = vsub.f32 %v387_v37, %v445_v54 }
 0x24d   :  { %v451_v53 = vpop.xlane.xlu2 %450 }
 0x24e   :  { %v463_v55 = vsub.f32 %v409_v38, %v451_v53  ;;  %v472_v59 = vmul.f32 1.442695, %v461_v56 }
 0x250   :  { %v997_v57 = vpop.eup %996  ;;  %v476_v58 = vmul.f32 1.442695, %v463_v55 }
 0x251   :  { %v999_v60 = vpop.eup %998  ;;  %v494_v62 = vsel %vm433_vm8, %v997_v57, 0.0 }
 0x252   :  { %1000 = vpow2.f32 %v476_v58  ;;  %v488_v63 = vsel %vm433_vm8, %v999_v60, 0.0  ;;  %495 = vadd.xlane.f32.xlu0 %v494_v62 }
 0x253   :  { %1002 = vpow2.f32 %v472_v59  ;;  %489 = vadd.xlane.f32.xlu1 %v488_v63  ;;  %v439_v3 = vpop.xlane.xlu1 %438 }
 0x254   :  { %v459_v6 = vsub.f32 %v365_v43, %v439_v3  ;;  %1004 = vpow2.f32 %v466_v1 }
 0x255   :  { %v454_v4 = vpop.xlane.xlu2 %453 }
 0x256   :  { %v464_v7 = vsub.f32 %v429_v42, %v454_v4  ;;  %v468_v9 = vmul.f32 1.442695, %v459_v6 }
 0x258   :  { %v1001_v8 = vpop.eup %1000  ;;  %v478_v10 = vmul.f32 1.442695, %v464_v7  ;;  %1006 = vpow2.f32 %v468_v9  ;;  %v974_v7 = vld [vmem:[%s1316_s2 + $0x8] sm:$0xff] }
 0x259   :  { %v1003_v11 = vpop.eup %1002  ;;  %v497_v13 = vsel %vm433_vm8, %v1001_v8, 0.0  ;;  %674 = vmatpush.bf16.msrb.mxu1 %v974_v7 }
 0x25a   :  { %v491_v14 = vsel %vm433_vm8, %v1003_v11, 0.0  ;;  %1008 = vpow2.f32 %v478_v10  ;;  %v1005_v17 = vpop.eup %1004 }
 0x25b   :  { %498 = vadd.xlane.f32.xlu1 %v497_v13  ;;  %492 = vadd.xlane.f32.xlu2 %v491_v14  ;;  %1010 = vpow2.f32 %v480_v15  ;;  %v482_v21 = vsel %vm433_vm8, %v1005_v17, 0.0 }
 0x25e   :  { %v1007_v18 = vpop.eup %1006 }
 0x25f   :  { %v485_v20 = vsel %vm433_vm8, %v1007_v18, 0.0 }
 0x260   :  { %v1009_v19 = vpop.eup %1008  ;;  %486 = vadd.xlane.f32.xlu0 %v485_v20 }
 0x261   :  { %v500_v22 = vsel %vm433_vm8, %v1009_v19, 0.0  ;;  %v1011_v23 = vpop.eup %1010 }
 0x262   :  { %v503_v24 = vsel %vm433_vm8, %v1011_v23, 0.0 }
 0x263   :  { %483 = vadd.xlane.f32.xlu2 %v482_v21  ;;  %501 = vadd.xlane.f32.xlu1 %v500_v22 }
 0x26b   :  { %504 = vadd.xlane.f32.xlu2 %v503_v24 }
 0x2c5   :  { %v496_v26 = vpop.xlane.xlu0 %495 }
 0x2c6   :  { %v490_v25 = vpop.xlane.xlu1 %489  ;;  %1012 = vrcp.f32 %v496_v26 }
 0x2c7   :  { %1014 = vrcp.f32 %v490_v25 }
 0x2cc   :  { %v1013_v29 = vpop.eup %1012 }
 0x2cd   :  { %v1015_v30 = vpop.eup %1014  ;;  %v518_v31 = vmul.f32 %v1013_v29, %v997_v57 }
 0x2ce   :  { %v499_v27 = vpop.xlane.xlu1 %498  ;;  %v493_v28 = vpop.xlane.xlu2 %492  ;;  %v516_v32 = vmul.f32 %v1015_v30, %v999_v60 }
 0x2cf   :  { %1016 = vrcp.f32 %v499_v27  ;;  %v526_v36 = vpack.c.bf16 %v518_v31, %v518_v31 }
 0x2d0   :  { %1018 = vrcp.f32 %v493_v28  ;;  %v524_v40 = vpack.c.bf16 %v516_v32, %v516_v32 }
 0x2d1   :  { %v588_v44 = vunpack.c.l.b16 %v526_v36 }
 0x2d2   :  { %v560_v46 = vunpack.c.l.b16 %v524_v40 }
 0x2d3   :  { %v487_v34 = vpop.xlane.xlu0 %486 }
 0x2d4   :  { %1020 = vrcp.f32 %v487_v34 }
 0x2d5   :  { %v1017_v33 = vpop.eup %1016 }
 0x2d6   :  { %v1019_v35 = vpop.eup %1018  ;;  %v519_v37 = vmul.f32 %v1017_v33, %v1001_v8  ;;  %v502_v38 = vpop.xlane.xlu1 %501  ;;  %v973_v8 = vld [vmem:[%s1316_s2] sm:$0xff] }
 0x2d7   :  { %v484_v39 = vpop.xlane.xlu2 %483  ;;  %v517_v41 = vmul.f32 %v1019_v35, %v1003_v11  ;;  %675 = vmatpush.bf16.msrb.mxu1 %v973_v8  ;;  %v975_v33 = vld [vmem:[%s1317_s3] sm:$0xff] }
 0x2d8   :  { %v527_v42 = vpack.c.bf16 %v519_v37, %v519_v37  ;;  %1022 = vrcp.f32 %v484_v39 }
 0x2d9   :  { %v525_v43 = vpack.c.bf16 %v517_v41, %v517_v41  ;;  %1024 = vrcp.f32 %v502_v38 }
 0x2da   :  { %v589_v45 = vunpack.c.l.b16 %v527_v42  ;;  %v1021_v48 = vpop.eup %1020 }
 0x2db   :  { %v561_v47 = vunpack.c.l.b16 %v525_v43  ;;  %v515_v51 = vmul.f32 %v1021_v48, %v1007_v18 }
 0x2dc   :  { %v590_v49 = vpack.c.b16 %v589_v45, %v588_v44 }
 0x2dd   :  { %v562_v50 = vpack.c.b16 %v561_v47, %v560_v46  ;;  %v523_v55 = vpack.c.bf16 %v515_v51, %v515_v51 }
 0x2de   :  { %v1023_v52 = vpop.eup %1022  ;;  %924 = vmatmul.msk.bf16.vlgmr.msra.gmra.mxu3 %vm433_vm8, %v590_v49 }
 0x2df   :  { %v505_v53 = vpop.xlane.xlu2 %504  ;;  %v1025_v54 = vpop.eup %1024  ;;  %v514_v56 = vmul.f32 %v1023_v52, %v1005_v17  ;;  %923 = vmatmul.msk.bf16.vlgmr.msra.gmra.mxu2 %vm433_vm8, %v562_v50  ;;  %v533_v57 = vunpack.c.l.b16 %v523_v55 }
 0x2e0   :  { %1026 = vrcp.f32 %v505_v53  ;;  %v520_v59 = vmul.f32 %v1025_v54, %v1009_v19 }
 0x2e1   :  { %v522_v58 = vpack.c.bf16 %v514_v56, %v514_v56 }
 0x2e2   :  { %v528_v63 = vpack.c.bf16 %v520_v59, %v520_v59  ;;  %v978_v59 = vld [vmem:[%s1318_s4 + $0x8] sm:$0xff] }
 0x2e3   :  { %v532_v60 = vunpack.c.l.b16 %v522_v58  ;;  %v979_v58 = vld [vmem:[%s1318_s4 + $0x10] sm:$0xff] }
 0x2e4   :  { %v616_v4 = vunpack.c.l.b16 %v528_v63 }
 0x2e5   :  { %v534_v62 = vpack.c.b16 %v533_v57, %v532_v60  ;;  %v980_v57 = vld [vmem:[%s1318_s4 + $0x18] sm:$0xff] }
 0x2e6   :  { %v1027_v61 = vpop.eup %1026  ;;  %841 = vmatpush.bf16.msrb.mxu3 %v980_v57 }
 0x2e7   :  { %v521_v1 = vmul.f32 %v1027_v61, %v1011_v23  ;;  %922 = vmatmul.msk.bf16.vlgmr.msra.gmra.mxu1 %vm433_vm8, %v534_v62 }
 0x2e9   :  { %v529_v3 = vpack.c.bf16 %v521_v1, %v521_v1 }
 0x2ea   :  { %842 = vmatpush.bf16.msrb.mxu3 %v979_v58 }
 0x2eb   :  { %v617_v5 = vunpack.c.l.b16 %v529_v3 }
 0x2ed   :  { %v618_v6 = vpack.c.b16 %v617_v5, %v616_v4  ;;  %v977_v4 = vld [vmem:[%s1318_s4] sm:$0xff]  ;;  %s1150_s4 = smov [#allocation8]  }
 0x2ee   :  { %843 = vmatpush.bf16.msrb.mxu3 %v978_v59 }
 0x2ef   :  { %925 = vmatmul.msk.bf16.vlgmr.msrb.gmra.mxu0 %vm433_vm8, %v618_v6  ;;  %vm833_vm8 = vcmask 523264  }
 0x2f2   :  { %844 = vmatpush.bf16.msrb.mxu3 %v977_v4 }
 0x361   :  { %v609_v11 = vpop.f32.mrf.mxu3 }
 0x362   :  { %v581_v9 = vpop.f32.mrf.mxu2 }
 0x364   :  { %v553_v10 = vpop.f32.mrf.mxu1 }
 0x365   :  { %v642_v15 = vadd.f32 %v581_v9, %v553_v10 }
 0x367   :  { %v644_v19 = vadd.f32 %v642_v15, %v609_v11 }
 0x369   :  { %v611_v18 = vpop.f32.mrf.mxu3 }
 0x36a   :  { %v583_v14 = vpop.f32.mrf.mxu2 }
 0x36c   :  { %v637_v12 = vpop.f32.mrf.mxu0  ;;  %v555_v13 = vpop.f32.mrf.mxu1 }
 0x36d   :  { %v643_v17 = vadd.f32 %v583_v14, %v555_v13  ;;  %v646_v22 = vadd.f32 %v644_v19, %v637_v12 }
 0x36f   :  { %v645_v20 = vadd.f32 %v643_v17, %v611_v18 }
 0x374   :  { %v639_v21 = vpop.f32.mrf.mxu0 }
 0x375   :  { %v647_v23 = vadd.f32 %v645_v20, %v639_v21 }
 0x377   :  { %v648_v24 = vpack.c.bf16 %v647_v23, %v646_v22 }
 0x379   :  { %934 = vmatmul.msk.bf16.vlgmr.msrb.gmra.mxu1 %vm79_vm0, %v648_v24 }
 0x3f6   :  { %v677_v25 = vpop.f32.mrf.mxu1 }
 0x3f7   :  { %v1268_v26 = vadd.f32 %v677_v25, %v1211_v0  ;;  %v976_v0 = vld [vmem:[%s1317_s3 + $0x8] sm:$0xff] }
 0x3f8   :  { %742 = vmatpush.bf16.msrb.mxu2 %v976_v0 }
 0x3f9   :  { %v682_v27 = vmul.f32 %v1268_v26, %v1268_v26 }
 0x3fb   :  { %v684_v28 = vsel %vm79_vm0, %v682_v27, 0.0 }
 0x3fc   :  { %685 = vadd.xlane.f32.xlu0 %v684_v28  ;;  %743 = vmatpush.bf16.msrb.mxu2 %v975_v33 }
 0x3fe   :  { %v679_v29 = vpop.f32.mrf.mxu1 }
 0x3ff   :  { %v1274_v30 = vadd.f32 %v679_v29, %v1218_v2 }
 0x401   :  { %v683_v31 = vmul.f32 %v1274_v30, %v1274_v30 }
 0x403   :  { %v687_v32 = vsel %vm79_vm0, %v683_v31, 0.0 }
 0x404   :  { %688 = vadd.xlane.f32.xlu1 %v687_v32 }
 0x46f   :  { %v686_v34 = vpop.xlane.xlu0 %685 }
 0x470   :  { %v690_v35 = vmul.f32 %v686_v34, %v1224_v16 }
 0x472   :  { %v692_v2 = vadd.f32 1e-05, %v690_v35 }
 0x474   :  { %1028 = vrsqrt.f32 %v692_v2  ;;  %vm700_vm10 = vweird.f32 %v692_v2 }
 0x477   :  { %v689_v36 = vpop.xlane.xlu1 %688 }
 0x478   :  { %v691_v37 = vmul.f32 %v689_v36, %v1224_v16 }
 0x47a   :  { %v1029_v38 = vpop.eup %1028  ;;  %v693_v39 = vadd.f32 1e-05, %v691_v37 }
 0x47b   :  { %v695_v40 = vmul.f32 %v1029_v38, %v692_v2  ;;  %vm701_vm9 = vweird.f32 %v1029_v38 }
 0x47c   :  { %1030 = vrsqrt.f32 %v693_v39  ;;  %vm702_vm12 = vmor %vm700_vm10, %vm701_vm9  ;;  %vm710_vm13 = vweird.f32 %v693_v39 }
 0x47d   :  { %v696_v41 = vmul.f32 %v1029_v38, %v695_v40 }
 0x47f   :  { %v697_v42 = vmul.f32 0.5, %v696_v41 }
 0x481   :  { %v698_v44 = vsub.f32 1.5, %v697_v42 }
 0x482   :  { %v1031_v43 = vpop.eup %1030 }
 0x483   :  { %v705_v45 = vmul.f32 %v1031_v43, %v693_v39  ;;  %v699_v47 = vmul.f32 %v1029_v38, %v698_v44  ;;  %vm711_vm11 = vweird.f32 %v1031_v43 }
 0x484   :  { %vm712_vm14 = vmor %vm710_vm13, %vm711_vm11 }
 0x485   :  { %v706_v46 = vmul.f32 %v1031_v43, %v705_v45  ;;  %v703_v50 = vsel %vm702_vm12, %v1029_v38, %v699_v47 }
 0x486   :  { %v714_v52 = vmul.f32 %v703_v50, %v1268_v26 }
 0x487   :  { %v707_v48 = vmul.f32 0.5, %v706_v46 }
 0x489   :  { %v708_v49 = vsub.f32 1.5, %v707_v48 }
 0x48b   :  { %v709_v51 = vmul.f32 %v1031_v43, %v708_v49 }
 0x48d   :  { %v713_v16 = vsel %vm712_vm14, %v1031_v43, %v709_v51 }
 0x48e   :  { %v715_v53 = vmul.f32 %v713_v16, %v1274_v30 }
 0x490   :  { %v716_v54 = vpack.c.bf16 %v715_v53, %v714_v52 }
 0x492   :  { %943 = vmatmul.msk.bf16.vlgmr.msrb.gmra.mxu2 %vm79_vm0, %v716_v54 }
 0x515   :  { %v745_v55 = vpop.f32.mrf.mxu2 }
 0x516   :  { %792 = vrot.lane.b32.xlu2 %v745_v55, %s1146_s5  ;;  %v944_v60 = vmul.f32 -1.442695, %v745_v55 }
 0x518   :  { %1032 = vpow2.f32 %v944_v60 }
 0x51d   :  { %v747_v56 = vpop.f32.mrf.mxu2 }
 0x51e   :  { %794 = vrot.lane.b32.xlu0 %v747_v56, %s1146_s5  ;;  %v945_v61 = vmul.f32 -1.442695, %v747_v56  ;;  %v1033_v62 = vpop.eup %1032  ;;  %s857_s5 = sshll.u32 %s1150_s4, 4  ;;  %s858_s5 = int_to_ptr.vmem [resolvable:$true] %s857_s5 }
 0x51f   :  { %v756_v1 = vadd.f32 1.0, %v1033_v62 }
 0x520   :  { %1034 = vpow2.f32 %v945_v61 }
 0x521   :  { %1036 = vrcp.f32 %v756_v1  ;;  %vm763_vm2 = vweird.f32 %v756_v1  ;;  %v769_v17 = vand.u32 2147483648, %v756_v1  ;;  %v767_v19 = vand.u32 2147483647, %v756_v1 }
 0x523   :  { %v770_v23 = vor.u32 1.1754944e-38, %v769_v17  ;;  %vm768_vm7 = vcmp.eq.f32.partialorder %v767_v19, 8.507059e+37 }
 0x526   :  { %v1035_v63 = vpop.eup %1034 }
 0x527   :  { %v757_v3 = vadd.f32 1.0, %v1035_v63  ;;  %v1037_v5 = vpop.eup %1036 }
 0x528   :  { %v759_v8 = vmul.f32 %v1037_v5, %v756_v1  ;;  %vm764_vm15 = vweird.f32 %v1037_v5 }
 0x529   :  { %1038 = vrcp.f32 %v757_v3  ;;  %v784_v15 = vand.u32 2147483648, %v757_v3  ;;  %vm778_vm3 = vweird.f32 %v757_v3  ;;  %v782_v18 = vand.u32 2147483647, %v757_v3  ;;  %vm765_vm4 = vmor %vm763_vm2, %vm764_vm15 }
 0x52a   :  { %v760_v10 = vsub.f32 1.0, %v759_v8 }
 0x52b   :  { %v785_v22 = vor.u32 1.1754944e-38, %v784_v15  ;;  %vm783_vm6 = vcmp.eq.f32.partialorder %v782_v18, 8.507059e+37 }
 0x52c   :  { %v761_v12 = vmul.f32 %v1037_v5, %v760_v10 }
 0x52e   :  { %v762_v14 = vadd.f32 %v1037_v5, %v761_v12 }
 0x52f   :  { %v1039_v6 = vpop.eup %1038 }
 0x530   :  { %v774_v7 = vmul.f32 %v1039_v6, %v757_v3  ;;  %vm779_vm1 = vweird.f32 %v1039_v6  ;;  %v766_v21 = vsel %vm765_vm4, %v1037_v5, %v762_v14 }
 0x531   :  { %vm780_vm5 = vmor %vm778_vm3, %vm779_vm1  ;;  %v771_v25 = vsel %vm768_vm7, %v770_v23, %v766_v21 }
 0x532   :  { %v775_v9 = vsub.f32 1.0, %v774_v7  ;;  %v788_v29 = vmul.f32 %v771_v25, %v745_v55 }
 0x534   :  { %v776_v11 = vmul.f32 %v1039_v6, %v775_v9 }
 0x536   :  { %v777_v13 = vadd.f32 %v1039_v6, %v776_v11 }
 0x538   :  { %v781_v20 = vsel %vm780_vm5, %v1039_v6, %v777_v13 }
 0x539   :  { %v786_v24 = vsel %vm783_vm6, %v785_v22, %v781_v20 }
 0x53a   :  { %v789_v28 = vmul.f32 %v786_v24, %v747_v56 }
 0x570   :  { %v793_v27 = vpop.permute.xlu2 %792 }
 0x571   :  { %v798_v32 = vmul.f32 %v793_v27, %v788_v29 }
 0x590   :  { %v795_v31 = vpop.permute.xlu0 %794 }
 0x591   :  { %v799_v0 = vmul.f32 %v795_v31, %v789_v28 }
 0x593   :  { %v800_v33 = vpack.c.bf16 %v799_v0, %v798_v32 }
 0x595   :  { %962 = vmatmul.msk.bf16.vlgmr.msrb.gmra.mxu3 %vm833_vm8, %v800_v33 }
 0x618   :  { %v846_v34 = vpop.f32.mrf.mxu3 }
 0x619   :  { %v847_v35 = vadd.f32 %v846_v34, %v1268_v26 }
 0x61b   :  { %851 = vst.msk [vmem:[#allocation8] sm:$0xff] %vm79_vm0, %v847_v35 }
 0x620   :  { %v848_v2 = vpop.f32.mrf.mxu3 }
 0x621   :  { %v849_v36 = vadd.f32 %v848_v2, %v1274_v30 }
 0x623   :  { %852 = vst.msk [vmem:[#allocation8 + $0x8] sm:$0xff] %vm79_vm0, %v849_v36 }
 0x624   :  { %865 = dma.vmem_to_hbm [thread:$0]  %s858_s5, 256, %s860_s15, [#allocation4], %s1143_s9, %s1143_s9, %s1144_s10  }
 0x625   :  { %1140 = dma.done.wait [#allocation4], 256  }
 0x626   :  { %1141 = vsyncadd [#allocation4], 4294967040 }
 0x627   :  { %870 = vsyncpa [#allocation3], 1 }
 0x628   :  { %871 = vsyncpa [#allocation6], 1 }
 0x629   :  { %872 = vsyncpa [#allocation4], 1 }

</bundles_post_ra>
